<compile_context>
chip_gen: v7x
topology: tpu7x:2x2x1
jax: 0.10.0
libtpu: 0.0.40
codegen_flags: <defaults>
</compile_context>

<pallas_src>
import numpy as np
import jax
import jax.numpy as jnp
from jax import lax
from jax.experimental import pallas as pl
from jax.experimental.pallas import tpu as pltpu

_PI = np.float32(np.pi)
_LANE = 128

# float32 output rows
_FROW_R, _FROW_THETA, _FROW_PHI, _FROW_MASK, _FROW_PX, _FROW_PY = 0, 1, 2, 3, 4, 5
_NF = 6
# int32 output rows
_IROW_U, _IROW_V = 0, 1
_NI = 2


# ---------------------------------------------------------------------------
# In-kernel math helpers (Cephes single-precision polynomials; match
# torch.atan2 / torch.asin to ~1 ulp in float32, built only from ops that
# lower on the TPU VPU/EUP: mul/add/div/rsqrt/abs/select).
# ---------------------------------------------------------------------------
def _atan(x):
    ax = jnp.abs(x)
    big = ax > 2.414213562373095                               # tan(3*pi/8)
    mid = (ax > 0.4142135623730950) & jnp.logical_not(big)     # tan(pi/8)
    # single selected divide: big -> -1/ax, mid -> (ax-1)/(ax+1), else -> ax/1
    num = jnp.where(big, -1.0, jnp.where(mid, ax - 1.0, ax))
    den = jnp.where(big, ax, jnp.where(mid, ax + 1.0, 1.0))
    xr = num / den
    y0 = jnp.where(big, _PI * 0.5, jnp.where(mid, _PI * 0.25, 0.0))
    z = xr * xr
    poly = ((8.05374449538e-2 * z - 1.38776856032e-1) * z
            + 1.99777106478e-1) * z - 3.33329491539e-1
    res = poly * z * xr + xr + y0
    return jnp.where(x < 0, -res, res)


def _atan2(y, x):
    safe_x = jnp.where(x == 0.0, 1.0, x)
    base = _atan(y / safe_x)
    return jnp.where(
        x > 0, base,
        jnp.where(
            x < 0, jnp.where(y >= 0, base + _PI, base - _PI),
            jnp.where(y > 0, _PI * 0.5, jnp.where(y < 0, -_PI * 0.5, 0.0))))


def _asin(x):
    a = jnp.minimum(jnp.abs(x), 1.0)
    flag = a > 0.5
    z_hi = 0.5 * (1.0 - a)
    z = jnp.where(flag, z_hi, a * a)
    w = jnp.where(flag, jnp.sqrt(z_hi), a)
    poly = ((((4.2163199048e-2 * z + 2.4181311049e-2) * z + 4.5470025998e-2) * z
             + 7.4953002686e-2) * z + 1.6666752422e-1)
    res = poly * z * w + w
    res = jnp.where(flag, _PI * 0.5 - 2.0 * res, res)
    return jnp.where(x < 0, -res, res)


# ---------------------------------------------------------------------------
# Pallas kernel: per-point spherical projection + range-view coordinates.
# ---------------------------------------------------------------------------
def make_rv_projection(h_fov, v_fov, width, height, max_tile_rows=256):
    h0 = np.float32(h_fov[0])
    v0 = np.float32(v_fov[0])
    Wf = np.float32(width)
    Hf = np.float32(height)
    inv_hspan = np.float32(1.0 / (float(h_fov[1]) - float(h_fov[0])))
    inv_vspan = np.float32(1.0 / (float(v_fov[1]) - float(v_fov[0])))
    inv_H = np.float32(1.0 / float(height))
    # tile_rows must be a multiple of 8 (sublane tiling)
    max_tile_rows = max(8, ((int(max_tile_rows) + 7) // 8) * 8)

    def kernel(xyz_ref, outf_ref, outi_ref):
        # xyz_ref: (3, tile_rows, 128); every slice below is a full-vreg tile.
        x = xyz_ref[0]
        y = xyz_ref[1]
        z = xyz_ref[2]
        s = x * x + y * y + z * z
        # one rsqrt feeds both the range and the asin argument:
        #   r = sqrt(s); z * inv_r == z / clamp_min(r, 1e-5)  (1e-10 = (1e-5)^2)
        inv_r = lax.rsqrt(jnp.maximum(s, 1e-10))
        r = s * inv_r                                          # torch.linalg.norm
        theta = -_atan2(y, x)                                  # azimuth
        phi = -_asin(z * inv_r)                                # elevation
        u_n = (theta - h0) * inv_hspan
        v_n = (phi - v0) * inv_vspan
        # (.long() in torch truncates toward zero -> fptosi)
        u_i = (u_n * Wf).astype(jnp.int32)
        v_i = (v_n * Hf).astype(jnp.int32)
        v_f = v_i.astype(jnp.float32)
        maskf = ((u_n >= 0.0) & (u_n < 1.0) &
                 (v_n >= 0.0) & (v_n < 1.0)).astype(jnp.float32)
        # per-row whole-tile stores (no jnp.stack temp)
        outf_ref[_FROW_R] = r
        outf_ref[_FROW_THETA] = theta
        outf_ref[_FROW_PHI] = phi
        outf_ref[_FROW_MASK] = maskf
        outf_ref[_FROW_PX] = (u_n - 0.5) * 2.0                 # px from continuous u_n
        outf_ref[_FROW_PY] = (v_f * inv_H - 0.5) * 2.0         # py from truncated v (as torch)
        outi_ref[_IROW_U] = u_i
        outi_ref[_IROW_V] = v_i

    @jax.jit
    def project(xyz):
        """xyz: (N, 3) float ->
        (6, N) f32 rows [r, theta, phi, mask, px, py] and (2, N) i32 rows [u, v]."""
        xyz = jnp.asarray(xyz, jnp.float32)
        n = xyz.shape[0]
        rows_needed = pl.cdiv(max(n, 1), _LANE)
        # aim for ~8 grid steps (even sharding across v7x's 2 TensorCores) but
        # cap per-step tile at max_tile_rows (in+out ~1.4 MiB at 256 rows,
        # double-buffered well inside the default scoped VMEM on v5e/v6e/v7x).
        target_tile = ((pl.cdiv(rows_needed, 8) + 7) // 8) * 8
        tile_rows = max(8, min(max_tile_rows, target_tile))
        n_blocks = pl.cdiv(rows_needed, tile_rows)
        rows_pad = n_blocks * tile_rows
        n_pad = rows_pad * _LANE

        # (3, n_pad) -> (3, rows_pad, 128); layout plumbing fused under this jit.
        xin = jnp.pad(xyz.T, ((0, 0), (0, n_pad - n))).reshape(3, rows_pad, _LANE)

        outf, outi = pl.pallas_call(
            kernel,
            out_shape=(
                jax.ShapeDtypeStruct((_NF, rows_pad, _LANE), jnp.float32),
                jax.ShapeDtypeStruct((_NI, rows_pad, _LANE), jnp.int32),
            ),
            grid_spec=pltpu.PrefetchScalarGridSpec(
                num_scalar_prefetch=0,
                grid=(n_blocks,),
                in_specs=[pl.BlockSpec((3, tile_rows, _LANE), lambda i: (0, i, 0))],
                out_specs=[
                    pl.BlockSpec((_NF, tile_rows, _LANE), lambda i: (0, i, 0)),
                    pl.BlockSpec((_NI, tile_rows, _LANE), lambda i: (0, i, 0)),
                ],
            ),
            compiler_params=pltpu.CompilerParams(
                dimension_semantics=("parallel",)),
        )(xin)
        return (outf.reshape(_NF, n_pad)[:, :n],
                outi.reshape(_NI, n_pad)[:, :n])

    return project


# ---------------------------------------------------------------------------
# RPTransformation (Pallas-backed) and BasicRangeProjection (plain-JAX glue).
# ---------------------------------------------------------------------------
class RPTransformationPallas:
    def __init__(self, h_fov=(-180, 180), width=2048, v_fov=(-10, 30), height=32,
                 use_ringID=False, ringID_idx=-1, h_upsample_ratio=1,
                 use_xyz=True, use_angle=True, ang_format='deg',
                 norm_cfg=dict(NORM_INPUT=False)):
        assert ang_format in ['deg', 'rad'], f'invalid ang_format: {ang_format}'
        self.h_fov = list(h_fov)
        self.v_fov = list(v_fov)
        if ang_format == 'deg':
            factor = 180.0 / np.pi
            self.h_fov = [a / factor for a in self.h_fov]
            self.v_fov = [a / factor for a in self.v_fov]
        self.width = int(width)
        self.height = int(height)
        self.use_ringID = use_ringID
        self.ringID_idx = ringID_idx
        self.h_upsample_ratio = h_upsample_ratio
        self.use_xyz = use_xyz
        self.use_angle = use_angle
        self.norm_input = norm_cfg['NORM_INPUT']
        # TODO(synk): NORM_INPUT, use_ringID and bilinear h_upsample paths not ported.
        assert not self.norm_input and not self.use_ringID and self.h_upsample_ratio == 1
        self._project = make_rv_projection(self.h_fov, self.v_fov,
                                           self.width, self.height)

    def project(self, xyz):
        """Pallas-backed per-point projection: xyz (N,3) -> ((6,N) f32, (2,N) i32)."""
        return self._project(xyz)

    def rvImage_from_proj(self, points, proj_f, proj_i):
        """points: (N, C); proj_f/(proj_i): kernel outputs for the same N points."""
        rThetaPhi = proj_f[0:3, :].T                          # (N, 3)
        keep = proj_f[_FROW_MASK, :] > 0.5
        u_all = proj_i[_IROW_U, :]
        v_all = proj_i[_IROW_V, :]

        # features built for ALL points (fixed shape); out-of-FOV points are
        # routed to an out-of-bounds pixel and dropped by the scatter below.
        feats = points[:, 3:]
        if self.use_xyz and self.use_angle:
            feats = jnp.concatenate([rThetaPhi, points[:, 0:3], feats], axis=1)
        elif self.use_xyz and not self.use_angle:
            feats = jnp.concatenate([rThetaPhi[:, 0:1], points[:, 0:3], feats], axis=1)
        elif (not self.use_xyz) and self.use_angle:
            feats = jnp.concatenate([rThetaPhi, feats], axis=1)
        else:
            feats = jnp.concatenate([rThetaPhi[:, 0:1], feats], axis=1)

        # TODO(synk): reference helper `point_to_range` is not defined in the source;
        # implemented as a per-pixel scatter into (1, C, H, W). With duplicate (v,u)
        # indices the XLA scatter winner is unspecified (torch indexed assignment is
        # last-write wins).
        v_sc = jnp.where(keep, v_all, self.height)            # OOB -> dropped
        u_sc = jnp.where(keep, u_all, self.width)
        rv = jnp.zeros((feats.shape[1], self.height, self.width), feats.dtype)
        rv = rv.at[:, v_sc, u_sc].set(feats.T, mode='drop')
        rv_image = rv[None]

        # variable-length (compacted) outputs, as in the torch reference.
        # TODO(synk): pad/bucket N to fixed sizes if these eager boolean
        # compactions dominate end-to-end wall clock.
        pxpy = jnp.stack([proj_f[_FROW_PX, :][keep],
                          proj_f[_FROW_PY, :][keep]], axis=-1)
        points_m = points[keep]
        rtp_m = rThetaPhi[keep]
        return rv_image, pxpy, jnp.concatenate([points_m, rtp_m], axis=-1)

    def points_to_rvImage(self, points):
        proj_f, proj_i = self.project(points[:, 0:3])
        return self.rvImage_from_proj(points, proj_f, proj_i)


class EasyDict(dict):
    def __getattr__(self, k):
        try:
            return self[k]
        except KeyError as e:
            raise AttributeError(k) from e


class BasicRangeProjection:
    def __init__(self, cfg, input_channels, **kwargs):
        self.cfg = cfg
        self.num_rv_features = input_channels
        self.num_point_features = input_channels + 3
        self.use_ringID = cfg.USE_RINGID
        self.use_xyz = cfg.get('USE_XYZ', True)
        self.use_angle = cfg.get('USE_ANGLE', True)
        if self.use_ringID:
            self.num_rv_features -= 1
        if self.use_xyz:
            self.num_rv_features += 3
        if not self.use_angle:
            self.num_rv_features -= 2
        proj_cfg = dict(h_fov=cfg.H_FOV, width=cfg.WIDTH, v_fov=cfg.V_FOV,
                        height=cfg.HEIGHT, use_ringID=self.use_ringID,
                        ringID_idx=cfg.RINGID_IDX,
                        ang_format=cfg.get('ANG_FORMAT', 'deg'),
                        use_xyz=self.use_xyz, use_angle=self.use_angle,
                        h_upsample_ratio=cfg.get('H_UPSAMPLE_RATIO', 1),
                        norm_cfg=cfg.get('NORM_CFG', dict(NORM_INPUT=False)))
        self.rp_trans_api = RPTransformationPallas(**proj_cfg)
        self.filter_gt_boxes = cfg.TRAIN_CFG.FILTER_GT_BOXES
        self.use_observation_angle = cfg.TRAIN_CFG.USE_OBSERVATION_ANGLE
        self.training = False   # eval-mode forward

    def __call__(self, batch_dict):
        points = batch_dict['points']
        bs_idx, pts = points[:, 0], points[:, 1:]
        batch_size = batch_dict['batch_size']

        # Single Pallas launch over ALL batch elements (projection is purely
        # per-point); per-batch masking/scatter happens on the host side.
        proj_f_all, proj_i_all = self.rp_trans_api.project(pts[:, 0:3])

        rv_images, points_list, pxpy_list = [], [], []
        for bs_cnt in range(batch_size):
            sel = bs_idx == bs_cnt
            one_point = pts[sel]
            one_proj_f = proj_f_all[:, sel]
            one_proj_i = proj_i_all[:, sel]
            rv_image, pxpy, one_point = self.rp_trans_api.rvImage_from_proj(
                one_point, one_proj_f, one_proj_i)
            one_point = jnp.concatenate(
                [jnp.full((one_point.shape[0], 1), bs_cnt, one_point.dtype), one_point],
                axis=1)
            pxpy = jnp.concatenate(
                [jnp.full((pxpy.shape[0], 1), bs_cnt, pxpy.dtype), pxpy], axis=1)
            rv_images.append(rv_image)
            points_list.append(one_point)
            pxpy_list.append(pxpy)
        rv_images = jnp.concatenate(rv_images, axis=0)
        batch_dict.update({
            'spatial_features': rv_images,                  # (B, C_rv, H, W)  NCHW
            'rv_img_shape': tuple(rv_images.shape[2:4]),
            'pxpy': jnp.concatenate(pxpy_list, axis=0),
            'points': jnp.concatenate(points_list, axis=0),
        })
        # TODO(synk): training-mode gt_boxes_rv branch (needs boxes_to_corners_3d) not ported.
        return batch_dict


if __name__ == "__main__":
    key = jax.random.PRNGKey(0)
    B, n_per, input_channels = 2, 200, 4
    H, W = 16, 64
    k1, k2 = jax.random.split(key)
    xyz = jax.random.normal(k1, (B * n_per, 3), dtype=jnp.float32) \
        * jnp.array([20.0, 20.0, 2.0], jnp.float32)
    intensity = jax.random.uniform(k2, (B * n_per, 1), dtype=jnp.float32)
    bs_col = jnp.repeat(jnp.arange(B, dtype=jnp.float32), n_per)[:, None]
    points = jnp.concatenate([bs_col, xyz, intensity], axis=1)   # (400, 1 + input_channels)

    cfg = EasyDict(
        USE_RINGID=False, USE_XYZ=True, USE_ANGLE=True,
        H_FOV=(-180.0, 180.0), WIDTH=W, V_FOV=(-25.0, 15.0), HEIGHT=H,
        RINGID_IDX=-1, ANG_FORMAT='deg', H_UPSAMPLE_RATIO=1,
        NORM_CFG=dict(NORM_INPUT=False),
        TRAIN_CFG=EasyDict(FILTER_GT_BOXES=False, USE_OBSERVATION_ANGLE=False),
    )

    model = BasicRangeProjection(cfg, input_channels=input_channels)
    batch_dict = {'points': points, 'batch_size': B}
    out = model(batch_dict)
    jax.block_until_ready(out['spatial_features'])
    assert out['spatial_features'].shape == (B, model.num_rv_features, H, W)
    assert out['pxpy'].shape[1] == 3 and out['points'].shape[1] == 1 + input_channels + 3
    assert bool(jnp.all(jnp.isfinite(out['spatial_features'])))
    print("KERNEL_OK")
</pallas_src>

<mosaic_0001>
module attributes {stable_mosaic.version = 11 : i64} {
  func.func @kernel(%arg0: i32, %arg1: memref<3x8x128xf32, #tpu.memory_space<vmem>>, %arg2: memref<6x8x128xf32, #tpu.memory_space<vmem>>, %arg3: memref<2x8x128xi32, #tpu.memory_space<vmem>>) attributes {dimension_semantics = [#tpu.dimension_semantics<parallel>], iteration_bounds = array<i64: 1>, scalar_prefetch = 0 : i64, scratch_operands = 0 : i64, tpu.core_type = #tpu.core_type<tc>, window_params = [{transform_indices = @transform_0, window_bounds = array<i64: 3, 8, 128>}, {transform_indices = @transform_1, window_bounds = array<i64: 6, 8, 128>}, {transform_indices = @transform_2, window_bounds = array<i64: 2, 8, 128>}]} {
    %c0 = arith.constant 0 : index
    %c0_0 = arith.constant 0 : index
    %c0_1 = arith.constant 0 : index
    %0 = vector.load %arg1[%c0, %c0_0, %c0_1] : memref<3x8x128xf32, #tpu.memory_space<vmem>>, vector<1x8x128xf32>
    %1 = vector.shape_cast %0 : vector<1x8x128xf32> to vector<8x128xf32>
    %c1 = arith.constant 1 : index
    %c0_2 = arith.constant 0 : index
    %c0_3 = arith.constant 0 : index
    %2 = vector.load %arg1[%c1, %c0_2, %c0_3] : memref<3x8x128xf32, #tpu.memory_space<vmem>>, vector<1x8x128xf32>
    %3 = vector.shape_cast %2 : vector<1x8x128xf32> to vector<8x128xf32>
    %c2 = arith.constant 2 : index
    %c0_4 = arith.constant 0 : index
    %c0_5 = arith.constant 0 : index
    %4 = vector.load %arg1[%c2, %c0_4, %c0_5] : memref<3x8x128xf32, #tpu.memory_space<vmem>>, vector<1x8x128xf32>
    %5 = vector.shape_cast %4 : vector<1x8x128xf32> to vector<8x128xf32>
    %6 = arith.mulf %1, %1 : vector<8x128xf32>
    %7 = arith.mulf %3, %3 : vector<8x128xf32>
    %8 = arith.addf %6, %7 : vector<8x128xf32>
    %9 = arith.mulf %5, %5 : vector<8x128xf32>
    %10 = arith.addf %8, %9 : vector<8x128xf32>
    %cst = arith.constant 1.000000e-10 : f32
    %11 = vector.broadcast %cst : f32 to vector<8x128xf32>
    %12 = arith.maximumf %10, %11 : vector<8x128xf32>
    %13 = math.rsqrt %12 : vector<8x128xf32>
    %14 = arith.mulf %10, %13 : vector<8x128xf32>
    %cst_6 = arith.constant 0.000000e+00 : f32
    %15 = vector.broadcast %cst_6 : f32 to vector<8x128xf32>
    %16 = arith.cmpf oeq, %1, %15 : vector<8x128xf32>
    %cst_7 = arith.constant 1.000000e+00 : f32
    %17 = vector.broadcast %cst_7 : f32 to vector<8x128xf32>
    %18 = arith.select %16, %17, %1 : vector<8x128xi1>, vector<8x128xf32>
    %19 = arith.divf %3, %18 : vector<8x128xf32>
    %20 = math.absf %19 : vector<8x128xf32>
    %cst_8 = arith.constant 2.41421366 : f32
    %21 = vector.broadcast %cst_8 : f32 to vector<8x128xf32>
    %22 = arith.cmpf ogt, %20, %21 : vector<8x128xf32>
    %cst_9 = arith.constant 0.414213568 : f32
    %23 = vector.broadcast %cst_9 : f32 to vector<8x128xf32>
    %24 = arith.cmpf ogt, %20, %23 : vector<8x128xf32>
    %cst_10 = arith.constant dense<true> : vector<8x128xi1>
    %25 = arith.xori %22, %cst_10 : vector<8x128xi1>
    %26 = arith.andi %24, %25 : vector<8x128xi1>
    %cst_11 = arith.constant 1.000000e+00 : f32
    %27 = vector.broadcast %cst_11 : f32 to vector<8x128xf32>
    %28 = arith.subf %20, %27 : vector<8x128xf32>
    %29 = arith.select %26, %28, %20 : vector<8x128xi1>, vector<8x128xf32>
    %cst_12 = arith.constant -1.000000e+00 : f32
    %30 = vector.broadcast %cst_12 : f32 to vector<8x128xf32>
    %31 = arith.select %22, %30, %29 : vector<8x128xi1>, vector<8x128xf32>
    %cst_13 = arith.constant 1.000000e+00 : f32
    %32 = vector.broadcast %cst_13 : f32 to vector<8x128xf32>
    %33 = arith.addf %20, %32 : vector<8x128xf32>
    %cst_14 = arith.constant 1.000000e+00 : f32
    %34 = vector.broadcast %cst_14 : f32 to vector<8x128xf32>
    %35 = arith.select %26, %33, %34 : vector<8x128xi1>, vector<8x128xf32>
    %36 = arith.select %22, %20, %35 : vector<8x128xi1>, vector<8x128xf32>
    %37 = arith.divf %31, %36 : vector<8x128xf32>
    %cst_15 = arith.constant 0.785398185 : f32
    %cst_16 = arith.constant 0.000000e+00 : f32
    %38 = vector.broadcast %cst_15 : f32 to vector<8x128xf32>
    %39 = vector.broadcast %cst_16 : f32 to vector<8x128xf32>
    %40 = arith.select %26, %38, %39 : vector<8x128xi1>, vector<8x128xf32>
    %cst_17 = arith.constant 1.57079637 : f32
    %41 = vector.broadcast %cst_17 : f32 to vector<8x128xf32>
    %42 = arith.select %22, %41, %40 : vector<8x128xi1>, vector<8x128xf32>
    %43 = arith.mulf %37, %37 : vector<8x128xf32>
    %cst_18 = arith.constant 0.0805374458 : f32
    %44 = vector.broadcast %cst_18 : f32 to vector<8x128xf32>
    %45 = arith.mulf %44, %43 : vector<8x128xf32>
    %cst_19 = arith.constant 0.138776854 : f32
    %46 = vector.broadcast %cst_19 : f32 to vector<8x128xf32>
    %47 = arith.subf %45, %46 : vector<8x128xf32>
    %48 = arith.mulf %47, %43 : vector<8x128xf32>
    %cst_20 = arith.constant 0.199777111 : f32
    %49 = vector.broadcast %cst_20 : f32 to vector<8x128xf32>
    %50 = arith.addf %48, %49 : vector<8x128xf32>
    %51 = arith.mulf %50, %43 : vector<8x128xf32>
    %cst_21 = arith.constant 0.333329499 : f32
    %52 = vector.broadcast %cst_21 : f32 to vector<8x128xf32>
    %53 = arith.subf %51, %52 : vector<8x128xf32>
    %54 = arith.mulf %53, %43 : vector<8x128xf32>
    %55 = arith.mulf %54, %37 : vector<8x128xf32>
    %56 = arith.addf %55, %37 : vector<8x128xf32>
    %57 = arith.addf %56, %42 : vector<8x128xf32>
    %cst_22 = arith.constant 0.000000e+00 : f32
    %58 = vector.broadcast %cst_22 : f32 to vector<8x128xf32>
    %59 = arith.cmpf olt, %19, %58 : vector<8x128xf32>
    %cst_23 = arith.constant 0.000000e+00 : f32
    %60 = vector.broadcast %cst_23 : f32 to vector<8x128xf32>
    %61 = arith.subf %60, %57 : vector<8x128xf32>
    %62 = arith.select %59, %61, %57 : vector<8x128xi1>, vector<8x128xf32>
    %cst_24 = arith.constant 0.000000e+00 : f32
    %63 = vector.broadcast %cst_24 : f32 to vector<8x128xf32>
    %64 = arith.cmpf ogt, %1, %63 : vector<8x128xf32>
    %cst_25 = arith.constant 0.000000e+00 : f32
    %65 = vector.broadcast %cst_25 : f32 to vector<8x128xf32>
    %66 = arith.cmpf olt, %1, %65 : vector<8x128xf32>
    %cst_26 = arith.constant 0.000000e+00 : f32
    %67 = vector.broadcast %cst_26 : f32 to vector<8x128xf32>
    %68 = arith.cmpf oge, %3, %67 : vector<8x128xf32>
    %cst_27 = arith.constant 3.14159274 : f32
    %69 = vector.broadcast %cst_27 : f32 to vector<8x128xf32>
    %70 = arith.addf %62, %69 : vector<8x128xf32>
    %cst_28 = arith.constant 3.14159274 : f32
    %71 = vector.broadcast %cst_28 : f32 to vector<8x128xf32>
    %72 = arith.subf %62, %71 : vector<8x128xf32>
    %73 = arith.select %68, %70, %72 : vector<8x128xi1>, vector<8x128xf32>
    %cst_29 = arith.constant 0.000000e+00 : f32
    %74 = vector.broadcast %cst_29 : f32 to vector<8x128xf32>
    %75 = arith.cmpf ogt, %3, %74 : vector<8x128xf32>
    %cst_30 = arith.constant 0.000000e+00 : f32
    %76 = vector.broadcast %cst_30 : f32 to vector<8x128xf32>
    %77 = arith.cmpf olt, %3, %76 : vector<8x128xf32>
    %cst_31 = arith.constant -1.57079637 : f32
    %cst_32 = arith.constant 0.000000e+00 : f32
    %78 = vector.broadcast %cst_31 : f32 to vector<8x128xf32>
    %79 = vector.broadcast %cst_32 : f32 to vector<8x128xf32>
    %80 = arith.select %77, %78, %79 : vector<8x128xi1>, vector<8x128xf32>
    %cst_33 = arith.constant 1.57079637 : f32
    %81 = vector.broadcast %cst_33 : f32 to vector<8x128xf32>
    %82 = arith.select %75, %81, %80 : vector<8x128xi1>, vector<8x128xf32>
    %83 = arith.select %66, %73, %82 : vector<8x128xi1>, vector<8x128xf32>
    %84 = arith.select %64, %62, %83 : vector<8x128xi1>, vector<8x128xf32>
    %cst_34 = arith.constant 0.000000e+00 : f32
    %85 = vector.broadcast %cst_34 : f32 to vector<8x128xf32>
    %86 = arith.subf %85, %84 : vector<8x128xf32>
    %87 = arith.mulf %5, %13 : vector<8x128xf32>
    %88 = math.absf %87 : vector<8x128xf32>
    %cst_35 = arith.constant 1.000000e+00 : f32
    %89 = vector.broadcast %cst_35 : f32 to vector<8x128xf32>
    %90 = arith.minimumf %88, %89 : vector<8x128xf32>
    %cst_36 = arith.constant 5.000000e-01 : f32
    %91 = vector.broadcast %cst_36 : f32 to vector<8x128xf32>
    %92 = arith.cmpf ogt, %90, %91 : vector<8x128xf32>
    %cst_37 = arith.constant 1.000000e+00 : f32
    %93 = vector.broadcast %cst_37 : f32 to vector<8x128xf32>
    %94 = arith.subf %93, %90 : vector<8x128xf32>
    %cst_38 = arith.constant 5.000000e-01 : f32
    %95 = vector.broadcast %cst_38 : f32 to vector<8x128xf32>
    %96 = arith.mulf %95, %94 : vector<8x128xf32>
    %97 = arith.mulf %90, %90 : vector<8x128xf32>
    %98 = arith.select %92, %96, %97 : vector<8x128xi1>, vector<8x128xf32>
    %99 = math.sqrt %96 : vector<8x128xf32>
    %100 = arith.select %92, %99, %90 : vector<8x128xi1>, vector<8x128xf32>
    %cst_39 = arith.constant 4.216320e-02 : f32
    %101 = vector.broadcast %cst_39 : f32 to vector<8x128xf32>
    %102 = arith.mulf %101, %98 : vector<8x128xf32>
    %cst_40 = arith.constant 0.024181312 : f32
    %103 = vector.broadcast %cst_40 : f32 to vector<8x128xf32>
    %104 = arith.addf %102, %103 : vector<8x128xf32>
    %105 = arith.mulf %104, %98 : vector<8x128xf32>
    %cst_41 = arith.constant 0.0454700254 : f32
    %106 = vector.broadcast %cst_41 : f32 to vector<8x128xf32>
    %107 = arith.addf %105, %106 : vector<8x128xf32>
    %108 = arith.mulf %107, %98 : vector<8x128xf32>
    %cst_42 = arith.constant 0.0749530047 : f32
    %109 = vector.broadcast %cst_42 : f32 to vector<8x128xf32>
    %110 = arith.addf %108, %109 : vector<8x128xf32>
    %111 = arith.mulf %110, %98 : vector<8x128xf32>
    %cst_43 = arith.constant 0.166667521 : f32
    %112 = vector.broadcast %cst_43 : f32 to vector<8x128xf32>
    %113 = arith.addf %111, %112 : vector<8x128xf32>
    %114 = arith.mulf %113, %98 : vector<8x128xf32>
    %115 = arith.mulf %114, %100 : vector<8x128xf32>
    %116 = arith.addf %115, %100 : vector<8x128xf32>
    %cst_44 = arith.constant 2.000000e+00 : f32
    %117 = vector.broadcast %cst_44 : f32 to vector<8x128xf32>
    %118 = arith.mulf %117, %116 : vector<8x128xf32>
    %cst_45 = arith.constant 1.57079637 : f32
    %119 = vector.broadcast %cst_45 : f32 to vector<8x128xf32>
    %120 = arith.subf %119, %118 : vector<8x128xf32>
    %121 = arith.select %92, %120, %116 : vector<8x128xi1>, vector<8x128xf32>
    %cst_46 = arith.constant 0.000000e+00 : f32
    %122 = vector.broadcast %cst_46 : f32 to vector<8x128xf32>
    %123 = arith.cmpf olt, %87, %122 : vector<8x128xf32>
    %cst_47 = arith.constant 0.000000e+00 : f32
    %124 = vector.broadcast %cst_47 : f32 to vector<8x128xf32>
    %125 = arith.subf %124, %121 : vector<8x128xf32>
    %126 = arith.select %123, %125, %121 : vector<8x128xi1>, vector<8x128xf32>
    %cst_48 = arith.constant 0.000000e+00 : f32
    %127 = vector.broadcast %cst_48 : f32 to vector<8x128xf32>
    %128 = arith.subf %127, %126 : vector<8x128xf32>
    %cst_49 = arith.constant -3.14159274 : f32
    %129 = vector.broadcast %cst_49 : f32 to vector<8x128xf32>
    %130 = arith.subf %86, %129 : vector<8x128xf32>
    %cst_50 = arith.constant 0.159154937 : f32
    %131 = vector.broadcast %cst_50 : f32 to vector<8x128xf32>
    %132 = arith.mulf %130, %131 : vector<8x128xf32>
    %cst_51 = arith.constant -0.436332315 : f32
    %133 = vector.broadcast %cst_51 : f32 to vector<8x128xf32>
    %134 = arith.subf %128, %133 : vector<8x128xf32>
    %cst_52 = arith.constant 1.4323945 : f32
    %135 = vector.broadcast %cst_52 : f32 to vector<8x128xf32>
    %136 = arith.mulf %134, %135 : vector<8x128xf32>
    %cst_53 = arith.constant 6.400000e+01 : f32
    %137 = vector.broadcast %cst_53 : f32 to vector<8x128xf32>
    %138 = arith.mulf %132, %137 : vector<8x128xf32>
    %139 = arith.fptosi %138 : vector<8x128xf32> to vector<8x128xi32>
    %cst_54 = arith.constant 1.600000e+01 : f32
    %140 = vector.broadcast %cst_54 : f32 to vector<8x128xf32>
    %141 = arith.mulf %136, %140 : vector<8x128xf32>
    %142 = arith.fptosi %141 : vector<8x128xf32> to vector<8x128xi32>
    %143 = arith.sitofp %142 : vector<8x128xi32> to vector<8x128xf32>
    %cst_55 = arith.constant 0.000000e+00 : f32
    %144 = vector.broadcast %cst_55 : f32 to vector<8x128xf32>
    %145 = arith.cmpf oge, %132, %144 : vector<8x128xf32>
    %cst_56 = arith.constant 1.000000e+00 : f32
    %146 = vector.broadcast %cst_56 : f32 to vector<8x128xf32>
    %147 = arith.cmpf olt, %132, %146 : vector<8x128xf32>
    %148 = arith.andi %145, %147 : vector<8x128xi1>
    %cst_57 = arith.constant 0.000000e+00 : f32
    %149 = vector.broadcast %cst_57 : f32 to vector<8x128xf32>
    %150 = arith.cmpf oge, %136, %149 : vector<8x128xf32>
    %151 = arith.andi %148, %150 : vector<8x128xi1>
    %cst_58 = arith.constant 1.000000e+00 : f32
    %152 = vector.broadcast %cst_58 : f32 to vector<8x128xf32>
    %153 = arith.cmpf olt, %136, %152 : vector<8x128xf32>
    %154 = arith.andi %151, %153 : vector<8x128xi1>
    %155 = arith.extui %154 : vector<8x128xi1> to vector<8x128xi32>
    %156 = arith.sitofp %155 : vector<8x128xi32> to vector<8x128xf32>
    %c0_59 = arith.constant 0 : index
    %c0_60 = arith.constant 0 : index
    %c0_61 = arith.constant 0 : index
    %157 = vector.load %arg2[%c0_59, %c0_60, %c0_61] : memref<6x8x128xf32, #tpu.memory_space<vmem>>, vector<1x8x128xf32>
    %158 = vector.shape_cast %157 : vector<1x8x128xf32> to vector<8x128xf32>
    %159 = vector.shape_cast %14 : vector<8x128xf32> to vector<1x8x128xf32>
    tpu.vector_store %arg2[%c0_59, %c0_60, %c0_61], %159 {strides = array<i32>} : memref<6x8x128xf32, #tpu.memory_space<vmem>>, vector<1x8x128xf32>,
    %c1_62 = arith.constant 1 : index
    %c0_63 = arith.constant 0 : index
    %c0_64 = arith.constant 0 : index
    %160 = vector.load %arg2[%c1_62, %c0_63, %c0_64] : memref<6x8x128xf32, #tpu.memory_space<vmem>>, vector<1x8x128xf32>
    %161 = vector.shape_cast %160 : vector<1x8x128xf32> to vector<8x128xf32>
    %162 = vector.shape_cast %86 : vector<8x128xf32> to vector<1x8x128xf32>
    tpu.vector_store %arg2[%c1_62, %c0_63, %c0_64], %162 {strides = array<i32>} : memref<6x8x128xf32, #tpu.memory_space<vmem>>, vector<1x8x128xf32>,
    %c2_65 = arith.constant 2 : index
    %c0_66 = arith.constant 0 : index
    %c0_67 = arith.constant 0 : index
    %163 = vector.load %arg2[%c2_65, %c0_66, %c0_67] : memref<6x8x128xf32, #tpu.memory_space<vmem>>, vector<1x8x128xf32>
    %164 = vector.shape_cast %163 : vector<1x8x128xf32> to vector<8x128xf32>
    %165 = vector.shape_cast %128 : vector<8x128xf32> to vector<1x8x128xf32>
    tpu.vector_store %arg2[%c2_65, %c0_66, %c0_67], %165 {strides = array<i32>} : memref<6x8x128xf32, #tpu.memory_space<vmem>>, vector<1x8x128xf32>,
    %c3 = arith.constant 3 : index
    %c0_68 = arith.constant 0 : index
    %c0_69 = arith.constant 0 : index
    %166 = vector.load %arg2[%c3, %c0_68, %c0_69] : memref<6x8x128xf32, #tpu.memory_space<vmem>>, vector<1x8x128xf32>
    %167 = vector.shape_cast %166 : vector<1x8x128xf32> to vector<8x128xf32>
    %168 = vector.shape_cast %156 : vector<8x128xf32> to vector<1x8x128xf32>
    tpu.vector_store %arg2[%c3, %c0_68, %c0_69], %168 {strides = array<i32>} : memref<6x8x128xf32, #tpu.memory_space<vmem>>, vector<1x8x128xf32>,
    %cst_70 = arith.constant 5.000000e-01 : f32
    %169 = vector.broadcast %cst_70 : f32 to vector<8x128xf32>
    %170 = arith.subf %132, %169 : vector<8x128xf32>
    %cst_71 = arith.constant 2.000000e+00 : f32
    %171 = vector.broadcast %cst_71 : f32 to vector<8x128xf32>
    %172 = arith.mulf %170, %171 : vector<8x128xf32>
    %c4 = arith.constant 4 : index
    %c0_72 = arith.constant 0 : index
    %c0_73 = arith.constant 0 : index
    %173 = vector.load %arg2[%c4, %c0_72, %c0_73] : memref<6x8x128xf32, #tpu.memory_space<vmem>>, vector<1x8x128xf32>
    %174 = vector.shape_cast %173 : vector<1x8x128xf32> to vector<8x128xf32>
    %175 = vector.shape_cast %172 : vector<8x128xf32> to vector<1x8x128xf32>
    tpu.vector_store %arg2[%c4, %c0_72, %c0_73], %175 {strides = array<i32>} : memref<6x8x128xf32, #tpu.memory_space<vmem>>, vector<1x8x128xf32>,
    %cst_74 = arith.constant 6.250000e-02 : f32
    %176 = vector.broadcast %cst_74 : f32 to vector<8x128xf32>
    %177 = arith.mulf %143, %176 : vector<8x128xf32>
    %cst_75 = arith.constant 5.000000e-01 : f32
    %178 = vector.broadcast %cst_75 : f32 to vector<8x128xf32>
    %179 = arith.subf %177, %178 : vector<8x128xf32>
    %cst_76 = arith.constant 2.000000e+00 : f32
    %180 = vector.broadcast %cst_76 : f32 to vector<8x128xf32>
    %181 = arith.mulf %179, %180 : vector<8x128xf32>
    %c5 = arith.constant 5 : index
    %c0_77 = arith.constant 0 : index
    %c0_78 = arith.constant 0 : index
    %182 = vector.load %arg2[%c5, %c0_77, %c0_78] : memref<6x8x128xf32, #tpu.memory_space<vmem>>, vector<1x8x128xf32>
    %183 = vector.shape_cast %182 : vector<1x8x128xf32> to vector<8x128xf32>
    %184 = vector.shape_cast %181 : vector<8x128xf32> to vector<1x8x128xf32>
    tpu.vector_store %arg2[%c5, %c0_77, %c0_78], %184 {strides = array<i32>} : memref<6x8x128xf32, #tpu.memory_space<vmem>>, vector<1x8x128xf32>,
    %c0_79 = arith.constant 0 : index
    %c0_80 = arith.constant 0 : index
    %c0_81 = arith.constant 0 : index
    %185 = vector.load %arg3[%c0_79, %c0_80, %c0_81] : memref<2x8x128xi32, #tpu.memory_space<vmem>>, vector<1x8x128xi32>
    %186 = vector.shape_cast %185 : vector<1x8x128xi32> to vector<8x128xi32>
    %187 = vector.shape_cast %139 : vector<8x128xi32> to vector<1x8x128xi32>
    tpu.vector_store %arg3[%c0_79, %c0_80, %c0_81], %187 {strides = array<i32>} : memref<2x8x128xi32, #tpu.memory_space<vmem>>, vector<1x8x128xi32>,
    %c1_82 = arith.constant 1 : index
    %c0_83 = arith.constant 0 : index
    %c0_84 = arith.constant 0 : index
    %188 = vector.load %arg3[%c1_82, %c0_83, %c0_84] : memref<2x8x128xi32, #tpu.memory_space<vmem>>, vector<1x8x128xi32>
    %189 = vector.shape_cast %188 : vector<1x8x128xi32> to vector<8x128xi32>
    %190 = vector.shape_cast %142 : vector<8x128xi32> to vector<1x8x128xi32>
    tpu.vector_store %arg3[%c1_82, %c0_83, %c0_84], %190 {strides = array<i32>} : memref<2x8x128xi32, #tpu.memory_space<vmem>>, vector<1x8x128xi32>,
    return
  }
  func.func @transform_0(%arg0: i32) -> (i32, i32, i32) {
    %c0_i32 = arith.constant 0 : i32
    %c0_i32_0 = arith.constant 0 : i32
    %c0_i32_1 = arith.constant 0 : i32
    return %c0_i32, %arg0, %c0_i32_0 : i32, i32, i32
  }
  func.func @transform_1(%arg0: i32) -> (i32, i32, i32) {
    %c0_i32 = arith.constant 0 : i32
    %c0_i32_0 = arith.constant 0 : i32
    %c0_i32_1 = arith.constant 0 : i32
    return %c0_i32, %arg0, %c0_i32_0 : i32, i32, i32
  }
  func.func @transform_2(%arg0: i32) -> (i32, i32, i32) {
    %c0_i32 = arith.constant 0 : i32
    %c0_i32_0 = arith.constant 0 : i32
    %c0_i32_1 = arith.constant 0 : i32
    return %c0_i32, %arg0, %c0_i32_0 : i32, i32, i32
  }
}

</mosaic_0001>

<bundles_post_ra>
// kernel: project.1
= control target key start
LH: loop header
LB: loop body
LE: loop exit
PB: predicated region body
PF: predicated region fallthrough
CT: control target
= control target key end

     0   :  { %vm179_vm3 = vmmov 1   ;;  %v180_v54 = vmov 0.0   ;;  %s270_s0 = inlined_call_operand.vmem [shape: f32[3,8,128], index: 0, kind: input, shape index: {}]   ;;  %s271_s1 = inlined_call_operand.vmem [shape: f32[6,8,128], index: 1, kind: output, shape index: {0}]   ;;  %s272_s2 = inlined_call_operand.vmem [shape: s32[2,8,128], index: 2, kind: output, shape index: {1}]  }
   0x1   :  { %v199_v0 = vld [vmem:[%s270_s0] sm:$0xff]  ;;  %v204_v1 = vld [vmem:[%s270_s0 + $0x8] sm:$0xff]  ;;  %v149_v2 = vld [vmem:[%s270_s0 + $0x10] sm:$0xff] }
   0x2   :  { %v15_v3 = vmul.f32 %v199_v0, %v199_v0  ;;  %v16_v4 = vmul.f32 %v204_v1, %v204_v1  ;;  %v18_v5 = vmul.f32 %v149_v2, %v149_v2  ;;  %vm23_vm0 = vcmp.eq.f32.partialorder %v199_v0, 0.0 }
   0x3   :  { %v24_v6 = vsel %vm23_vm0, 1.0, %v199_v0  ;;  %vm63_vm9 = vcmp.lt.f32.partialorder %v204_v1, 0.0  ;;  %vm62_vm10 = vcmp.gt.f32.partialorder %v204_v1, 0.0  ;;  %vm58_vm13 = vcmp.ge.f32.partialorder %v204_v1, 0.0 }
   0x4   :  { %v17_v7 = vadd.f32 %v16_v4, %v15_v3  ;;  %171 = vrcp.f32 %v24_v6  ;;  %vm57_vm14 = vcmp.lt.f32.partialorder %v199_v0, 0.0  ;;  %vm56_vm15 = vcmp.gt.f32.partialorder %v199_v0, 0.0 }
   0x6   :  { %v19_v8 = vadd.f32 %v18_v5, %v17_v7 }
   0x8   :  { %v20_v9 = vmax.f32 %v19_v8, 1e-10 }
   0xa   :  { %173 = vrsqrt.f32 %v20_v9 }
   0xe   :  { %v172_v10 = vpop.eup %171 }
   0xf   :  { %v216_v11 = vmul.f32 %v172_v10, %v204_v1 }
  0x11   :  { %v27_v12 = vand.u32 2147483647, %v216_v11  ;;  %vm53_vm11 = vcmp.lt.f32.partialorder %v216_v11, 0.0 }
  0x13   :  { %vm28_vm1 = vcmp.gt.f32.partialorder %v27_v12, 2.4142137  ;;  %vm29_vm2 = vcmp.gt.f32.partialorder %v27_v12, 0.41421357  ;;  %v35_v13 = vadd.f32 1.0, %v27_v12  ;;  %v150_v21 = vadd.f32 -1.0, %v27_v12 }
  0x14   :  { %v174_v14 = vpop.eup %173  ;;  %vm30_vm4 = vmxor %vm28_vm1, %vm179_vm3 }
  0x15   :  { %v22_v15 = vmul.f32 %v174_v14, %v19_v8  ;;  %vm220_vm5 = vmand %vm29_vm2, %vm30_vm4  ;;  %v224_v17 = vmul.f32 %v174_v14, %v149_v2  ;;  %v64_v2 = vsel %vm63_vm9, -1.5707964, %v180_v54 }
  0x16   :  { %v36_v18 = vsel %vm220_vm5, %v35_v13, 1.0  ;;  %v33_v25 = vsel %vm220_vm5, %v150_v21, %v27_v12  ;;  %v40_v55 = vsel %vm220_vm5, 0.7853982, %v180_v54  ;;  %v65_v7 = vsel %vm62_vm10, 1.5707964, %v64_v2 }
  0x17   :  { %121 = vst [vmem:[%s271_s1] sm:$0xff] %v22_v15  ;;  %v37_v19 = vsel %vm28_vm1, %v27_v12, %v36_v18  ;;  %v70_v20 = vand.u32 2147483647, %v224_v17  ;;  %v34_v28 = vsel %vm28_vm1, -1.0, %v33_v25  ;;  %v41_v59 = vsel %vm28_vm1, 1.5707964, %v40_v55 }
  0x18   :  { %175 = vrcp.f32 %v37_v19  ;;  %vm99_vm12 = vcmp.lt.f32.partialorder %v224_v17, 0.0 }
  0x19   :  { %v71_v22 = vmin.f32 %v70_v20, 1.0 }
  0x1b   :  { %v73_v23 = vsub.f32 1.0, %v71_v22  ;;  %v75_v24 = vmul.f32 %v71_v22, %v71_v22  ;;  %vm72_vm6 = vcmp.gt.f32.partialorder %v71_v22, 0.5 }
  0x1d   :  { %v74_v26 = vmul.f32 0.5, %v73_v23 }
  0x1f   :  { %v76_v27 = vsel %vm72_vm6, %v74_v26, %v75_v24  ;;  %177 = vrsqrt.f32 %v74_v26  ;;  %vm79_vm7 = vcmp.eq.f32.partialorder %v74_v26, inf  ;;  %v82_v40 = vand.u32 2147483648, %v74_v26 }
  0x20   :  { %v85_v29 = vmul.f32 0.0421632, %v76_v27  ;;  %vm81_vm8 = vcmp.eq.f32.partialorder %v74_v26, 0.0 }
  0x22   :  { %v176_v30 = vpop.eup %175  ;;  %v86_v31 = vadd.f32 0.024181312, %v85_v29 }
  0x23   :  { %v39_v32 = vmul.f32 %v176_v30, %v34_v28 }
  0x24   :  { %v87_v33 = vmul.f32 %v86_v31, %v76_v27 }
  0x25   :  { %v42_v34 = vmul.f32 %v39_v32, %v39_v32 }
  0x26   :  { %v88_v35 = vadd.f32 0.045470025, %v87_v33 }
  0x27   :  { %v43_v36 = vmul.f32 0.080537446, %v42_v34 }
  0x28   :  { %v89_v37 = vmul.f32 %v88_v35, %v76_v27 }
  0x29   :  { %v178_v38 = vpop.eup %177  ;;  %v151_v39 = vadd.f32 -0.13877685, %v43_v36 }
  0x2a   :  { %v78_v41 = vmul.f32 %v178_v38, %v74_v26  ;;  %v90_v42 = vadd.f32 0.074953005, %v89_v37 }
  0x2b   :  { %v45_v43 = vmul.f32 %v151_v39, %v42_v34 }
  0x2c   :  { %v80_v44 = vsel %vm79_vm7, %v74_v26, %v78_v41  ;;  %v91_v45 = vmul.f32 %v90_v42, %v76_v27 }
  0x2d   :  { %v46_v46 = vadd.f32 0.19977711, %v45_v43  ;;  %v83_v47 = vsel %vm81_vm8, %v82_v40, %v80_v44 }
  0x2e   :  { %v92_v48 = vadd.f32 0.16666752, %v91_v45  ;;  %v84_v50 = vsel %vm72_vm6, %v83_v47, %v71_v22 }
  0x2f   :  { %v47_v49 = vmul.f32 %v46_v46, %v42_v34 }
  0x30   :  { %v93_v51 = vmul.f32 %v92_v48, %v76_v27 }
  0x31   :  { %v152_v52 = vadd.f32 -0.3333295, %v47_v49 }
  0x32   :  { %v94_v53 = vmul.f32 %v93_v51, %v84_v50 }
  0x33   :  { %v49_v56 = vmul.f32 %v152_v52, %v42_v34 }
  0x34   :  { %v95_v57 = vadd.f32 %v94_v53, %v84_v50 }
  0x35   :  { %v50_v58 = vmul.f32 %v49_v56, %v39_v32 }
  0x36   :  { %v96_v60 = vmul.f32 2.0, %v95_v57 }
  0x37   :  { %v51_v61 = vadd.f32 %v50_v58, %v39_v32 }
  0x38   :  { %v97_v62 = vsub.f32 1.5707964, %v96_v60 }
  0x39   :  { %v52_v63 = vadd.f32 %v51_v61, %v41_v59 }
  0x3a   :  { %v98_v3 = vsel %vm72_vm6, %v97_v62, %v95_v57 }
  0x3b   :  { %v54_v4 = vsub.f32 0.0, %v52_v63  ;;  %v100_v5 = vsub.f32 0.0, %v98_v3 }
  0x3d   :  { %v55_v6 = vsel %vm53_vm11, %v54_v4, %v52_v63  ;;  %v101_v8 = vsel %vm99_vm12, %v100_v5, %v98_v3 }
  0x3e   :  { %v59_v9 = vadd.f32 3.1415927, %v55_v6  ;;  %v153_v10 = vadd.f32 -3.1415927, %v55_v6  ;;  %v102_v12 = vsub.f32 0.0, %v101_v8 }
  0x40   :  { %v61_v11 = vsel %vm58_vm13, %v59_v9, %v153_v10  ;;  %v155_v13 = vadd.f32 0.43633232, %v102_v12  ;;  %158 = vst [vmem:[%s271_s1 + $0x10] sm:$0xff] %v102_v12 }
  0x41   :  { %v66_v14 = vsel %vm57_vm14, %v61_v11, %v65_v7 }
  0x42   :  { %v67_v15 = vsel %vm56_vm15, %v55_v6, %v66_v14  ;;  %v106_v16 = vmul.f32 1.4323945, %v155_v13 }
  0x43   :  { %v68_v17 = vsub.f32 0.0, %v67_v15 }
  0x44   :  { %v109_v1 = vmul.f32 16.0, %v106_v16  ;;  %vm115_vm0 = vcmp.ge.f32.partialorder %v106_v16, 0.0  ;;  %vm117_vm1 = vcmp.lt.f32.partialorder %v106_v16, 1.0 }
  0x45   :  { %v154_v18 = vadd.f32 3.1415927, %v68_v17  ;;  %157 = vst [vmem:[%s271_s1 + $0x8] sm:$0xff] %v68_v17 }
  0x46   :  { %v167_v19 = vtrunc.f32 %v109_v1 }
  0x47   :  { %v104_v20 = vmul.f32 0.15915494, %v154_v18 }
  0x48   :  { %v168_v0 = vcvt.f32.s32 %v167_v19 }
  0x49   :  { %vm112_vm2 = vcmp.ge.f32.partialorder %v104_v20, 0.0  ;;  %vm113_vm3 = vcmp.lt.f32.partialorder %v104_v20, 1.0  ;;  %v160_v21 = vadd.f32 -0.5, %v104_v20  ;;  %v107_v22 = vmul.f32 64.0, %v104_v20 }
  0x4a   :  { %vm114_vm4 = vmand %vm112_vm2, %vm113_vm3  ;;  %v111_v23 = vcvt.s32.f32 %v168_v0  ;;  %164 = vst [vmem:[%s272_s2 + $0x8] sm:$0xff] %v168_v0 }
  0x4b   :  { %vm116_vm5 = vmand %vm114_vm4, %vm115_vm0  ;;  %v129_v24 = vmul.f32 2.0, %v160_v21  ;;  %v165_v25 = vtrunc.f32 %v107_v22 }
  0x4c   :  { %vm118_vm6 = vmand %vm116_vm5, %vm117_vm1  ;;  %v132_v26 = vmul.f32 0.0625, %v111_v23 }
  0x4d   :  { %v156_v27 = vsel %vm118_vm6, 1.0, %v180_v54  ;;  %161 = vst [vmem:[%s271_s1 + $0x20] sm:$0xff] %v129_v24  ;;  %v166_v28 = vcvt.f32.s32 %v165_v25 }
  0x4e   :  { %159 = vst [vmem:[%s271_s1 + $0x18] sm:$0xff] %v156_v27  ;;  %v162_v29 = vadd.f32 -0.5, %v132_v26 }
  0x4f   :  { %137 = vst [vmem:[%s272_s2] sm:$0xff] %v166_v28 }
  0x50   :  { %v134_v30 = vmul.f32 2.0, %v162_v29 }
  0x52   :  { %163 = vst [vmem:[%s271_s1 + $0x28] sm:$0xff] %v134_v30 }

</bundles_post_ra>
